<compile_context>
chip_gen: v7x
topology: tpu7x:2x2x1
jax: 0.10.0
libtpu: 0.0.40
codegen_flags: <defaults>
</compile_context>

<pallas_src>
import numpy as np

import jax
import jax.numpy as jnp
from jax.experimental import pallas as pl
from jax.experimental.pallas import tpu as pltpu


def concatenate_points(points):
    """Glue equivalent of @concatenate_inputs: column-concat a list of arrays."""
    if isinstance(points, (list, tuple)):
        return jnp.concatenate([jnp.asarray(p) for p in points], axis=-1)
    return jnp.asarray(points)


def _round_up(x, m):
    return (x + m - 1) // m * m


def _min_sublane(dtype):
    # f32 -> 8 sublanes, bf16 -> 16, int8/fp8 -> 32 (packed sublane layout).
    return {4: 8, 2: 16, 1: 32}.get(jnp.dtype(dtype).itemsize, 8)


def _vmem_capacity_bytes():
    try:
        return int(pltpu.get_tpu_info().vmem_capacity_bytes)
    except Exception:
        return 64 << 20  # conservative fallback (v7x per-TC physical VMEM)


def _static_scalar_value(c):
    """Return a Python float if `c` is a compile-time scalar, else None."""
    if isinstance(c, (bool, int, float, np.generic)):
        return float(c)
    if isinstance(c, np.ndarray) and c.ndim == 0:
        return float(c)
    return None


# ---------------------------------------------------------------------------
# Fused kernel: out = points @ W + constant
# (the two-linear case is folded into this one via W = W1 + W2)
# ---------------------------------------------------------------------------
def _make_linear_kernel_static(constant):
    add_const = constant != 0.0

    def kernel(x_ref, w_ref, o_ref):
        acc = jnp.dot(x_ref[...], w_ref[...], preferred_element_type=jnp.float32)
        if add_const:
            acc = acc + jnp.float32(constant)
        o_ref[...] = acc.astype(o_ref.dtype)

    return kernel


def _linear_kernel_smem(c_ref, x_ref, w_ref, o_ref):
    # c_ref: SMEM scalar-prefetch ref of shape (1,), used for traced constants.
    acc = jnp.dot(x_ref[...], w_ref[...], preferred_element_type=jnp.float32)
    o_ref[...] = (acc + c_ref[0]).astype(o_ref.dtype)


def _added_linear_call(points, weight, constant, out_dtype=None):
    """out = points @ weight + constant, as a single fused pallas_call."""
    x = concatenate_points(points)
    w = jnp.asarray(weight)
    n, d = x.shape
    dw, m = w.shape
    assert dw == d
    if out_dtype is None:
        # TODO(synk): for integer inputs the f32 acc + constant followed by the
        # final cast truncates rather than rounds; guard if ints ever appear.
        out_dtype = jnp.result_type(x.dtype, w.dtype)

    sub = _min_sublane(x.dtype)
    x_item = jnp.dtype(x.dtype).itemsize
    w_item = jnp.dtype(w.dtype).itemsize
    o_item = jnp.dtype(out_dtype).itemsize

    # ---- tile selection (VMEM-aware, generation-agnostic) -------------------
    n_pad = _round_up(n, sub)
    m_pad = _round_up(m, 128)              # lane-dense output (unmasked vst)

    if n_pad < 256:
        tn = n_pad                         # single row tile (small problems)
    elif n_pad <= 1024:
        # >=2 row steps so a dual-TC part (v7x) can shard the parallel axis;
        # the extra ~0.35 us step is noise on single-TC v5e/v6e.
        tn = _round_up(pl.cdiv(n_pad, 2), sub)
    else:
        tn = 512                           # ~85% of HBM roofline vs ~63% at 256

    tm = m_pad if m_pad <= 1024 else 512   # keep W untiled along M when it fits

    cap = _vmem_capacity_bytes()
    budget = int(0.6 * cap)                # headroom for pipeline scratch

    def footprint(tn_, tm_):
        # double-buffered x block + w block + out block
        return 2 * (tn_ * d * x_item + d * tm_ * w_item + tn_ * tm_ * o_item)

    while footprint(tn, tm) > budget:
        if tm >= tn and tm > 128:
            tm = max(128, tm // 2)
        elif tn > sub:
            tn = max(sub, _round_up(tn // 2, sub))
        else:
            break

    n_pad = _round_up(n, tn)
    m_pad = _round_up(m, tm)

    if (n_pad, m_pad) != (n, m):           # ragged N / M handled via pad + slice
        x = jnp.pad(x, ((0, n_pad - n), (0, 0)))
        w = jnp.pad(w, ((0, 0), (0, m_pad - m)))

    need = footprint(tn, tm)
    vmem_limit = max(int(1.5 * need), 16 << 20)
    vmem_limit = min(vmem_limit, int(0.9 * cap), 100 << 20)
    vmem_limit = max(vmem_limit, need)     # never clamp below the footprint

    n_blocks = n_pad // tn
    m_blocks = m_pad // tm

    # ---- grid-axis ordering --------------------------------------------------
    # If M is tiled and the weights outweigh X, put M outer / N inner so each
    # W tile stays VMEM-resident across the N sweep (only X re-streams).
    w_bytes = d * m_pad * w_item
    x_bytes = n_pad * d * x_item
    if m_blocks > 1 and w_bytes > x_bytes:
        grid = (m_blocks, n_blocks)
        x_map = lambda j, i, *_: (i, 0)
        w_map = lambda j, i, *_: (0, j)
        o_map = lambda j, i, *_: (i, j)
    else:
        grid = (n_blocks, m_blocks)
        x_map = lambda i, j, *_: (i, 0)
        w_map = lambda i, j, *_: (0, j)
        o_map = lambda i, j, *_: (i, j)

    x_spec = pl.BlockSpec((tn, d), x_map)
    w_spec = pl.BlockSpec((d, tm), w_map)
    o_spec = pl.BlockSpec((tn, tm), o_map)

    compiler_params = pltpu.CompilerParams(
        dimension_semantics=("parallel", "parallel"),
        vmem_limit_bytes=vmem_limit,
    )
    out_shape = jax.ShapeDtypeStruct((n_pad, m_pad), out_dtype)

    static_c = _static_scalar_value(constant)
    if static_c is not None:
        # Constant baked into the kernel body; no scalar-prefetch machinery.
        out = pl.pallas_call(
            _make_linear_kernel_static(static_c),
            out_shape=out_shape,
            grid=grid,
            in_specs=[x_spec, w_spec],
            out_specs=o_spec,
            compiler_params=compiler_params,
        )(x, w)
    else:
        # Traced constant: SMEM scalar-prefetch path.
        c = jnp.reshape(jnp.asarray(constant, jnp.float32), (1,))
        out = pl.pallas_call(
            _linear_kernel_smem,
            out_shape=out_shape,
            grid_spec=pltpu.PrefetchScalarGridSpec(
                num_scalar_prefetch=1,
                grid=grid,
                in_specs=[x_spec, w_spec],
                out_specs=o_spec,
            ),
            compiler_params=compiler_params,
        )(c, x, w)
    return out[:n, :m]


def added_function_linear_plus_constant(points, w, constant):
    """AddedFunction(LinearFunction(W), constant) -> points @ W + constant."""
    return _added_linear_call(points, w, constant)


def added_function_two_linear(points, w1, w2, constant=0.0):
    """AddedFunction(LinearFunction(W1), LinearFunction(W2)) (+ constant).

    Uses distributivity: X@W1 + X@W2 == X@(W1+W2).  The weight sum is done
    once (in f32 when the weights are low-precision) so the kernel runs a
    single dot with half the MXU work and half the weight HBM traffic.
    """
    w1 = jnp.asarray(w1)
    w2 = jnp.asarray(w2)
    w_dtype = jnp.result_type(w1.dtype, w2.dtype)
    w_sum = (w1.astype(jnp.float32) + w2.astype(jnp.float32)).astype(w_dtype)
    return _added_linear_call(points, w_sum, constant)


# ---------------------------------------------------------------------------
# Generic AddedFunction(fun1, fun2) on already-evaluated arrays: out = y1 + y2
# Any matching rank/shape; flattened to a lane-dense (rows, 128) layout.
# Dtype promotion happens inside the kernel (no wrapper-side HBM copies).
# ---------------------------------------------------------------------------
def _add_cast_kernel(y1_ref, y2_ref, o_ref):
    o_ref[...] = y1_ref[...].astype(o_ref.dtype) + y2_ref[...].astype(o_ref.dtype)


def added_function_elementwise(y1, y2):
    y1 = jnp.asarray(y1)
    y2 = jnp.asarray(y2)
    assert y1.shape == y2.shape
    out_dtype = jnp.result_type(y1.dtype, y2.dtype)
    orig_shape = y1.shape
    size = int(np.prod(orig_shape)) if orig_shape else 1

    lane = 128
    sub = max(_min_sublane(y1.dtype), _min_sublane(y2.dtype), _min_sublane(out_dtype))
    tr_max = 1024                           # rows per grid step (512 KiB f32 blocks)

    y1f = y1.reshape(-1)                    # casts happen inside the kernel
    y2f = y2.reshape(-1)

    if size % lane == 0 and (size // lane) <= tr_max:
        # Lane-aligned and small enough for one step: block == full array dims,
        # so no (8,128) divisibility requirement and no padding copies at all.
        rows_pad = size // lane
        tr = rows_pad
    else:
        rows = pl.cdiv(size, lane)
        if rows <= tr_max:
            rows_pad = _round_up(rows, sub)
            tr = rows_pad                   # single-step grid, fully VMEM-resident
        else:
            tr = tr_max
            rows_pad = _round_up(rows, tr)
        pad = rows_pad * lane - size
        if pad:
            y1f = jnp.pad(y1f, (0, pad))
            y2f = jnp.pad(y2f, (0, pad))
    y1f = y1f.reshape(rows_pad, lane)
    y2f = y2f.reshape(rows_pad, lane)

    item_sum = (jnp.dtype(y1.dtype).itemsize + jnp.dtype(y2.dtype).itemsize
                + jnp.dtype(out_dtype).itemsize)
    need = 2 * tr * lane * item_sum         # 2 in + 1 out, double-buffered
    cap = _vmem_capacity_bytes()
    vmem_limit = max(int(1.5 * need), 16 << 20)
    vmem_limit = min(vmem_limit, int(0.9 * cap), 100 << 20)
    vmem_limit = max(vmem_limit, need)

    out = pl.pallas_call(
        _add_cast_kernel,
        out_shape=jax.ShapeDtypeStruct((rows_pad, lane), out_dtype),
        grid=(rows_pad // tr,),
        in_specs=[
            pl.BlockSpec((tr, lane), lambda i: (i, 0)),
            pl.BlockSpec((tr, lane), lambda i: (i, 0)),
        ],
        out_specs=pl.BlockSpec((tr, lane), lambda i: (i, 0)),
        compiler_params=pltpu.CompilerParams(
            dimension_semantics=("parallel",),
            vmem_limit_bytes=vmem_limit,
        ),
    )(y1f, y2f)
    return out.reshape(-1)[:size].reshape(orig_shape)


if __name__ == "__main__":
    key = jax.random.PRNGKey(0)
    k_pts, k_w1, k_w2, k_big, k_y = jax.random.split(key, 5)

    # Small shapes: N=16 evaluation points, D=32 state dim, M=128 output dim.
    n, d, m = 16, 32, 128
    points = jax.random.normal(k_pts, (n, d), dtype=jnp.float32)
    w1 = jax.random.normal(k_w1, (d, m), dtype=jnp.float32) * 0.1
    w2 = jax.random.normal(k_w2, (d, m), dtype=jnp.float32) * 0.1
    constant = 2.5  # auto-wrapped into ConstantFunction by AddedFunction.__init__

    # Case A: AddedFunction(LinearFunction(w1), 2.5) -> single fused VMEM block,
    # constant baked into the kernel body.
    out_a = jax.block_until_ready(
        added_function_linear_plus_constant(points, w1, constant))
    ref_a = points @ w1 + constant
    assert jnp.allclose(out_a, ref_a, atol=1e-4, rtol=1e-4)

    # Case B: AddedFunction(LinearFunction(w1), LinearFunction(w2)) ->
    # distributivity: one dot against (w1 + w2).
    out_b = jax.block_until_ready(added_function_two_linear(points, w1, w2))
    ref_b = points @ w1 + points @ w2
    assert jnp.allclose(out_b, ref_b, atol=1e-4, rtol=1e-4)

    # Case C: ragged / multi-step N grid (N=600 -> 2 row tiles, pad + slice).
    n2, m2 = 600, 200
    points2 = jax.random.normal(k_big, (n2, d), dtype=jnp.float32)
    w3 = jax.random.normal(k_w1, (d, m2), dtype=jnp.float32) * 0.1
    out_c = jax.block_until_ready(
        added_function_linear_plus_constant(points2, w3, -1.25))
    ref_c = points2 @ w3 - 1.25
    assert jnp.allclose(out_c, ref_c, atol=1e-4, rtol=1e-4)

    # Case D: traced (non-static) constant -> SMEM scalar-prefetch path.
    c_traced = jnp.float32(0.75)
    out_d = jax.block_until_ready(
        added_function_linear_plus_constant(points, w1, c_traced))
    ref_d = points @ w1 + 0.75
    assert jnp.allclose(out_d, ref_d, atol=1e-4, rtol=1e-4)

    # Case E: large ragged M -> M tiled, M-outer grid ordering (W tiles stay
    # VMEM-resident across the N sweep).
    n3, m3 = 64, 1500
    points3 = jax.random.normal(k_y, (n3, d), dtype=jnp.float32)
    w4 = jax.random.normal(k_w2, (d, m3), dtype=jnp.float32) * 0.1
    out_e = jax.block_until_ready(
        added_function_linear_plus_constant(points3, w4, 0.5))
    ref_e = points3 @ w4 + 0.5
    assert jnp.allclose(out_e, ref_e, atol=1e-4, rtol=1e-4)

    # Case F: generic AddedFunction of two evaluated arrays (arbitrary rank,
    # ragged size -> pad path; casts inside the kernel).
    y1 = jax.random.normal(k_y, (4, 10, 37), dtype=jnp.float32)
    y2 = jax.random.normal(k_pts, (4, 10, 37), dtype=jnp.float32)
    out_f = jax.block_until_ready(added_function_elementwise(y1, y2))
    assert jnp.allclose(out_f, y1 + y2, atol=1e-5, rtol=1e-5)

    # Case G: mismatched dtypes (bf16 + f32), lane-aligned size -> no pad, no
    # wrapper-side casts.
    y3 = jax.random.normal(k_w1, (8, 256), dtype=jnp.bfloat16)
    y4 = jax.random.normal(k_w2, (8, 256), dtype=jnp.float32)
    out_g = jax.block_until_ready(added_function_elementwise(y3, y4))
    assert jnp.allclose(out_g, y3.astype(jnp.float32) + y4, atol=1e-2, rtol=1e-2)

    print("KERNEL_OK")
</pallas_src>

<mosaic_0001>
module attributes {stable_mosaic.version = 11 : i64} {
  func.func @kernel(%arg0: i32, %arg1: i32, %arg2: memref<16x32xf32, #tpu.memory_space<vmem>>, %arg3: memref<32x128xf32, #tpu.memory_space<vmem>>, %arg4: memref<16x128xf32, #tpu.memory_space<vmem>>) attributes {dimension_semantics = [#tpu.dimension_semantics<parallel>, #tpu.dimension_semantics<parallel>], iteration_bounds = array<i64: 1, 1>, scalar_prefetch = 0 : i64, scratch_operands = 0 : i64, tpu.core_type = #tpu.core_type<tc>, window_params = [{transform_indices = @transform_0, window_bounds = array<i64: 16, 32>}, {transform_indices = @transform_1, window_bounds = array<i64: 32, 128>}, {transform_indices = @transform_2, window_bounds = array<i64: 16, 128>}]} {
    %c0 = arith.constant 0 : index
    %c0_0 = arith.constant 0 : index
    %0 = vector.load %arg2[%c0, %c0_0] : memref<16x32xf32, #tpu.memory_space<vmem>>, vector<16x32xf32>
    %c0_1 = arith.constant 0 : index
    %c0_2 = arith.constant 0 : index
    %1 = vector.load %arg3[%c0_1, %c0_2] : memref<32x128xf32, #tpu.memory_space<vmem>>, vector<32x128xf32>
    %cst = arith.constant dense<0.000000e+00> : vector<16x128xf32>
    %2 = tpu.matmul %0, %1, %cst {dimension_numbers = #tpu.dot_dimension_numbers<[1], [0], [0], [1], [0, 0, 1, 1], [], []>} : vector<16x32xf32>, vector<32x128xf32>, vector<16x128xf32> -> vector<16x128xf32>
    %cst_3 = arith.constant 2.500000e+00 : f32
    %3 = vector.broadcast %cst_3 : f32 to vector<16x128xf32>
    %4 = arith.addf %2, %3 : vector<16x128xf32>
    %c0_4 = arith.constant 0 : index
    %c0_5 = arith.constant 0 : index
    %5 = vector.load %arg4[%c0_4, %c0_5] : memref<16x128xf32, #tpu.memory_space<vmem>>, vector<16x128xf32>
    tpu.vector_store %arg4[%c0_4, %c0_5], %4 {strides = array<i32>} : memref<16x128xf32, #tpu.memory_space<vmem>>, vector<16x128xf32>,
    return
  }
  func.func @transform_0(%arg0: i32, %arg1: i32) -> (i32, i32) {
    %c0_i32 = arith.constant 0 : i32
    %c0_i32_0 = arith.constant 0 : i32
    return %arg0, %c0_i32 : i32, i32
  }
  func.func @transform_1(%arg0: i32, %arg1: i32) -> (i32, i32) {
    %c0_i32 = arith.constant 0 : i32
    %c0_i32_0 = arith.constant 0 : i32
    return %c0_i32, %arg1 : i32, i32
  }
  func.func @transform_2(%arg0: i32, %arg1: i32) -> (i32, i32) {
    %c0_i32 = arith.constant 0 : i32
    return %arg0, %arg1 : i32, i32
  }
}

</mosaic_0001>

<bundles_post_ra>
// kernel: tpu_custom_call.1
= control target key start
LH: loop header
LB: loop body
LE: loop exit
PB: predicated region body
PF: predicated region fallthrough
CT: control target
= control target key end

     0   :  { %7 = vsyncpa [#allocation3], 0  ;;  %s317_s0 = inlined_call_operand.hbm [shape: f32[16,32], index: 0, kind: input, shape index: {}]   ;;  %s318_s1 = inlined_call_operand.hbm [shape: f32[32,128], index: 1, kind: input, shape index: {}]   ;;  %s319_s2 = inlined_call_operand.hbm [shape: f32[16,128], index: 2, kind: output, shape index: {}]  }
   0x1   :  { %8 = vsyncpa [#allocation6], 0 }
   0x2   :  { %9 = vsyncpa [#allocation4], 0  ;;  %s252_s9 = smov [#allocation2]   ;;  %s180_s13 = scalar_lea.hbm %s317_s0, 256 }
   0x3   :  { %s15_s10 = sshll.u32 %s252_s9, 4  ;;  %p181_p0 = scmp.ne.s32.totalorder %s317_s0, %s180_s13  ;;  %s16_s10 = int_to_ptr.vmem [resolvable:$true] %s15_s10 }
   0x4   :  { %p184_p1 = scmp.lt.u32.totalorder %s180_s13, %s317_s0 }
   0x6   :  { %p186_p2 = pnand %p184_p1, %p181_p0 }
   0x8   :  { %189 = shalt.err (!%p186_p2)
}
   0x9   :  { %s190_s18 = scalar_lea.vmem %s16_s10, 256  ;;  %p195_p4 = scmp.lt.s32.totalorder %s16_s10, %s16_s10 }
   0xa   :  { %p191_p3 = scmp.ne.s32.totalorder %s16_s10, %s190_s18  ;;  %p196_p5 = scmp.lt.s32.totalorder %s190_s18, %s190_s18 }
   0xc   :  { %p197_p6 = por %p196_p5, %p195_p4 }
   0xe   :  { %p198_p7 = pnand %p197_p6, %p191_p3 }
  0x10   :  { %201 = shalt.err (!%p198_p7)
}
  0x11   :  { %s253_s19 = smov 128   ;;  %s254_s20 = smov 8  }
  0x12   :  { %21 = dma.hbm_to_vmem [thread:$0]  %s317_s0, 256, %s16_s10, [#allocation3], %s253_s19, %s253_s19, %s254_s20  }
  0x13   :  { %s255_s23 = smov [#allocation5]   ;;  %s202_s27 = scalar_lea.hbm %s318_s1, 512 }
  0x14   :  { %s27_s24 = sshll.u32 %s255_s23, 4  ;;  %p203_p8 = scmp.ne.s32.totalorder %s318_s1, %s202_s27  ;;  %s28_s24 = int_to_ptr.vmem [resolvable:$true] %s27_s24 }
  0x15   :  { %p206_p9 = scmp.lt.u32.totalorder %s202_s27, %s318_s1 }
  0x17   :  { %p208_p10 = pnand %p206_p9, %p203_p8 }
  0x19   :  { %211 = shalt.err (!%p208_p10)
}
  0x1a   :  { %s212_s4 = scalar_lea.vmem %s28_s24, 512  ;;  %p217_p12 = scmp.lt.s32.totalorder %s28_s24, %s28_s24 }
  0x1b   :  { %p213_p11 = scmp.ne.s32.totalorder %s28_s24, %s212_s4  ;;  %p218_p13 = scmp.lt.s32.totalorder %s212_s4, %s212_s4 }
  0x1d   :  { %p219_p0 = por %p218_p13, %p217_p12 }
  0x1f   :  { %p220_p1 = pnand %p219_p0, %p213_p11 }
  0x21   :  { %223 = shalt.err (!%p220_p1)
}
  0x22   :  { %33 = dma.hbm_to_vmem [thread:$0]  %s318_s1, 512, %s28_s24, [#allocation6], %s253_s19, %s253_s19, %s254_s20  }
  0x23   :  { %246 = dma.done.wait [#allocation3], 256  }
  0x24   :  { %247 = vsyncadd [#allocation3], 4294967040 }
  0x25   :  { %248 = dma.done.wait [#allocation6], 512  }
  0x26   :  { %249 = vsyncadd [#allocation6], 4294966784  ;;  %vm46_vm0 = vcmask 261120   ;;  %v42_v0 = vld [vmem:[#allocation5] sm:$0xff]  ;;  %v43_v1 = vld [vmem:[#allocation5 + $0x8] sm:$0xff]  ;;  %s256_s1 = smov [#allocation7]  }
  0x27   :  { %v44_v2 = vld [vmem:[#allocation5 + $0x10] sm:$0xff]  ;;  %v167_v3 = vpack.c.bf16 %v43_v1, %v42_v0  ;;  %v45_v4 = vld [vmem:[#allocation5 + $0x18] sm:$0xff]  ;;  %s135_s6 = sshll.u32 %s256_s1, 4  ;;  %s136_s6 = int_to_ptr.vmem [resolvable:$true] %s135_s6 }
  0x28   :  { %v40_v5 = vld [vmem:[#allocation2] sm:$0xff]  ;;  %v171_v6 = vpack.c.bf16 %v45_v4, %v44_v2  ;;  %v41_v7 = vld [vmem:[#allocation2 + $0x8] sm:$0xff]  ;;  %s224_s7 = scalar_lea.vmem %s136_s6, 256  ;;  %p229_p3 = scmp.lt.s32.totalorder %s136_s6, %s136_s6 }
  0x29   :  { %164 = vmatprep.mubr.msk.f32.mxu0 %vm46_vm0, %v40_v5  ;;  %168 = vmatprep.subr.bf16.mxu0 %v167_v3  ;;  %p225_p2 = scmp.ne.s32.totalorder %s136_s6, %s224_s7  ;;  %p230_p4 = scmp.lt.s32.totalorder %s224_s7, %s224_s7 }
  0x2a   :  { %170 = vmatpush3.bf16.msra.mxu0 %v167_v3 }
  0x2b   :  { %172 = vmatprep.subr.bf16.mxu0 %v171_v6  ;;  %p231_p5 = por %p230_p4, %p229_p3 }
  0x2d   :  { %p232_p6 = pnand %p231_p5, %p225_p2 }
  0x2e   :  { %174 = vmatpush3.bf16.msra.mxu0 %v171_v6 }
  0x31   :  { %165 = vmatmul.mubr.msk.f32.vlgmr.msra.gmra.mrb[0].mxu0 %vm46_vm0, %v41_v7 }
 0x104   :  { %v166_v8 = vpop.f32.mrb[0].mxu0 }
 0x105   :  { %v125_v9 = vadd.f32 2.5, %v166_v8  ;;  %v119_v10 = vpop.f32.mrb[1].mxu0 }
 0x106   :  { %v120_v11 = vadd.f32 2.5, %v119_v10 }
 0x107   :  { %129 = vst [vmem:[#allocation7 + $0x8] sm:$0xff] %v125_v9 }
 0x108   :  { %128 = vst [vmem:[#allocation7] sm:$0xff] %v120_v11 }
 0x109   :  { %235 = shalt.err (!%p232_p6)
}
 0x10a   :  { %s236_s10 = scalar_lea.hbm %s319_s2, 256 }
 0x10b   :  { %p237_p7 = scmp.ne.s32.totalorder %s319_s2, %s236_s10  ;;  %p240_p8 = scmp.lt.u32.totalorder %s236_s10, %s319_s2 }
 0x10d   :  { %p242_p9 = pnand %p240_p8, %p237_p7 }
 0x10f   :  { %245 = shalt.err (!%p242_p9)
}
 0x110   :  { %141 = dma.vmem_to_hbm [thread:$0]  %s136_s6, 256, %s319_s2, [#allocation4], %s253_s19, %s253_s19, %s254_s20  }
 0x111   :  { %250 = dma.done.wait [#allocation4], 256  }
 0x112   :  { %251 = vsyncadd [#allocation4], 4294967040 }
 0x113   :  { %145 = vsyncpa [#allocation3], 1 }
 0x114   :  { %146 = vsyncpa [#allocation6], 1 }
 0x115   :  { %147 = vsyncpa [#allocation4], 1 }

</bundles_post_ra>
